<compile_context>
chip_gen: v5e
topology: v5e:2x2
jax: 0.10.0
libtpu: 0.0.40
codegen_flags: <defaults>
</compile_context>

<pallas_src>
import functools

import jax
import jax.numpy as jnp
from jax.experimental import pallas as pl
from jax.experimental.pallas import tpu as pltpu


def _fused_conv_bias_relu_kernel(x_ref, w_ref, b_ref, o_ref, *, shifts, md):
    """One image: dense conv on the flattened padded grid + bias + ReLU.

    x_ref: (Cin_pad, L)        zero-padded image, spatial dims flattened (resident)
    w_ref: (T, Cout, Cin_pad)  per-tap weight matrices (resident)
    b_ref: (Cout, 1)           bias (resident)
    o_ref: (Cout, Md)          dense output on the padded grid (lane-dense)
    """
    acc = jnp.zeros(o_ref.shape, jnp.float32)
    for t, s in enumerate(shifts):                 # static unroll over KH*KW taps
        xs = x_ref[:, s:s + md]                    # (Cin_pad, Md) shifted slice
        acc = acc + jnp.dot(w_ref[t], xs, preferred_element_type=jnp.float32)
    acc = acc + b_ref[...]                         # broadcast along the lane axis
    o_ref[...] = jnp.maximum(acc, 0.0).astype(o_ref.dtype)


def basic_conv2d_pallas(x_nchw, weight, bias, *, padding=1):
    """Conv2d(KHxKW, stride 1, `padding`, bias=True) + ReLU, PyTorch semantics.

    x_nchw : (N, Cin, H, W)       float32
    weight : (Cout, Cin, KH, KW)  PyTorch OIHW layout
    bias   : (Cout,)
    returns: (N, Cout, Ho, Wo)
    """
    N, Cin, H, W = x_nchw.shape
    Cout, _, KH, KW = weight.shape
    Ho = H + 2 * padding - KH + 1
    Wo = W + 2 * padding - KW + 1
    W_pad = W + 2 * padding

    # Flattened padded-grid geometry: dense output index p = h*W_pad + w reads
    # x_flat[p + kh*W_pad + kw]; the valid outputs are the first Wo columns of
    # each of the Ho dense rows (the rest is cropped after the kernel).
    T = KH * KW
    Md = Ho * W_pad                                     # dense output length
    shifts = tuple(kh * W_pad + kw for kh in range(KH) for kw in range(KW))
    extra_rows = pl.cdiv(KW - 1, W_pad)                 # keep the largest shifted read in-bounds
    H_pad = H + 2 * padding + extra_rows
    L = H_pad * W_pad                                   # flattened image length
    Cin_pad = ((Cin + 7) // 8) * 8                      # sublane-align the contraction dim

    # Glue: ONE zero-pad of x (channels + spatial) and a free reshape.
    xp = jnp.pad(
        x_nchw,
        ((0, 0), (0, Cin_pad - Cin),
         (padding, padding + extra_rows), (padding, padding)),
    )
    x_flat = xp.reshape(N, Cin_pad, L)
    # Only the tiny weight tensor is reordered: (kh,kw)-major taps of (Cout, Cin_pad).
    w_taps = jnp.pad(
        jnp.transpose(weight, (2, 3, 0, 1)),
        ((0, 0), (0, 0), (0, 0), (0, Cin_pad - Cin)),
    ).reshape(T, Cout, Cin_pad)
    b_col = bias.reshape(Cout, 1)

    # Tiny grids: keep the whole thing on one core; big batches: shard across cores.
    sem = "parallel" if N >= 8 else "arbitrary"

    kernel = functools.partial(_fused_conv_bias_relu_kernel, shifts=shifts, md=Md)
    out_dense = pl.pallas_call(
        kernel,
        out_shape=jax.ShapeDtypeStruct((N, Cout, Md), x_nchw.dtype),
        grid_spec=pl.GridSpec(
            grid=(N,),
            in_specs=[
                pl.BlockSpec((pl.Squeezed(), Cin_pad, L), lambda n: (n, 0, 0)),   # image (streamed per step)
                pl.BlockSpec((T, Cout, Cin_pad), lambda n: (0, 0, 0)),            # weights (resident)
                pl.BlockSpec((Cout, 1), lambda n: (0, 0)),                        # bias (resident)
            ],
            out_specs=pl.BlockSpec((pl.Squeezed(), Cout, Md), lambda n: (n, 0, 0)),
        ),
        compiler_params=pltpu.CompilerParams(dimension_semantics=(sem,)),
    )(x_flat, w_taps, b_col)

    # Crop the padded-grid garbage columns; layout is already NCHW.
    return out_dense.reshape(N, Cout, Ho, W_pad)[:, :, :, :Wo]


if __name__ == "__main__":
    key = jax.random.PRNGKey(0)
    k_x, k_w, k_b = jax.random.split(key, 3)

    N, Cin, H, W = 2, 4, 16, 16
    Cout, KH, KW = 8, 3, 3

    x = jax.random.normal(k_x, (N, Cin, H, W), dtype=jnp.float32)
    # Deterministic "kaiming-uniform-ish" init (synthetic, not a checkpoint).
    fan_in = Cin * KH * KW
    bound = 1.0 / (fan_in ** 0.5)
    weight = jax.random.uniform(k_w, (Cout, Cin, KH, KW), jnp.float32, -bound, bound)
    bias = jax.random.uniform(k_b, (Cout,), jnp.float32, -bound, bound)

    out = basic_conv2d_pallas(x, weight, bias)
    out = jax.block_until_ready(out)

    # Sanity vs. pure-JAX reference (same semantics as PyTorch conv + ReLU).
    ref = jax.lax.conv_general_dilated(
        x, weight, window_strides=(1, 1), padding=((1, 1), (1, 1)),
        dimension_numbers=("NCHW", "OIHW", "NCHW"),
    ) + bias.reshape(1, Cout, 1, 1)
    ref = jnp.maximum(ref, 0.0)
    assert out.shape == (N, Cout, H, W)
    assert jnp.allclose(out, ref, atol=1e-4, rtol=1e-4)

    print("KERNEL_OK")
</pallas_src>

<mosaic_0001>
module attributes {stable_mosaic.version = 11 : i64} {
  func.func @_fused_conv_bias_relu_kernel(%arg0: i32, %arg1: memref<1x8x342xf32, #tpu.memory_space<vmem>>, %arg2: memref<9x8x8xf32, #tpu.memory_space<vmem>>, %arg3: memref<8x1xf32, #tpu.memory_space<vmem>>, %arg4: memref<1x8x288xf32, #tpu.memory_space<vmem>>) attributes {dimension_semantics = [#tpu.dimension_semantics<arbitrary>], iteration_bounds = array<i64: 2>, scalar_prefetch = 0 : i64, scratch_operands = 0 : i64, tpu.core_type = #tpu.core_type<tc>, window_params = [{transform_indices = @transform_0, window_bounds = array<i64: 1, 8, 342>}, {pipeline_mode = #tpu.pipeline_mode<synchronous>, transform_indices = @transform_1, window_bounds = array<i64: 9, 8, 8>}, {pipeline_mode = #tpu.pipeline_mode<synchronous>, transform_indices = @transform_2, window_bounds = array<i64: 8, 1>}, {transform_indices = @transform_3, window_bounds = array<i64: 1, 8, 288>}]} {
    %cst = arith.constant 0.000000e+00 : f32
    %0 = vector.broadcast %cst : f32 to vector<8x288xf32>
    %c0 = arith.constant 0 : index
    %c0_0 = arith.constant 0 : index
    %c0_1 = arith.constant 0 : index
    %1 = vector.load %arg1[%c0, %c0_0, %c0_1] : memref<1x8x342xf32, #tpu.memory_space<vmem>>, vector<1x8x288xf32>
    %2 = vector.shape_cast %1 : vector<1x8x288xf32> to vector<8x288xf32>
    %c0_2 = arith.constant 0 : index
    %c0_3 = arith.constant 0 : index
    %c0_4 = arith.constant 0 : index
    %3 = vector.load %arg2[%c0_2, %c0_3, %c0_4] : memref<9x8x8xf32, #tpu.memory_space<vmem>>, vector<1x8x8xf32>
    %4 = vector.shape_cast %3 : vector<1x8x8xf32> to vector<8x8xf32>
    %cst_5 = arith.constant dense<0.000000e+00> : vector<8x288xf32>
    %5 = tpu.matmul %4, %2, %cst_5 {dimension_numbers = #tpu.dot_dimension_numbers<[1], [0], [0], [1], [0, 0, 1, 1], [], []>} : vector<8x8xf32>, vector<8x288xf32>, vector<8x288xf32> -> vector<8x288xf32>
    %6 = arith.addf %0, %5 : vector<8x288xf32>
    %c0_6 = arith.constant 0 : index
    %c0_7 = arith.constant 0 : index
    %c1 = arith.constant 1 : index
    %7 = vector.load %arg1[%c0_6, %c0_7, %c1] : memref<1x8x342xf32, #tpu.memory_space<vmem>>, vector<1x8x288xf32>
    %8 = vector.shape_cast %7 : vector<1x8x288xf32> to vector<8x288xf32>
    %c1_8 = arith.constant 1 : index
    %c0_9 = arith.constant 0 : index
    %c0_10 = arith.constant 0 : index
    %9 = vector.load %arg2[%c1_8, %c0_9, %c0_10] : memref<9x8x8xf32, #tpu.memory_space<vmem>>, vector<1x8x8xf32>
    %10 = vector.shape_cast %9 : vector<1x8x8xf32> to vector<8x8xf32>
    %cst_11 = arith.constant dense<0.000000e+00> : vector<8x288xf32>
    %11 = tpu.matmul %10, %8, %cst_11 {dimension_numbers = #tpu.dot_dimension_numbers<[1], [0], [0], [1], [0, 0, 1, 1], [], []>} : vector<8x8xf32>, vector<8x288xf32>, vector<8x288xf32> -> vector<8x288xf32>
    %12 = arith.addf %6, %11 : vector<8x288xf32>
    %c0_12 = arith.constant 0 : index
    %c0_13 = arith.constant 0 : index
    %c2 = arith.constant 2 : index
    %13 = vector.load %arg1[%c0_12, %c0_13, %c2] : memref<1x8x342xf32, #tpu.memory_space<vmem>>, vector<1x8x288xf32>
    %14 = vector.shape_cast %13 : vector<1x8x288xf32> to vector<8x288xf32>
    %c2_14 = arith.constant 2 : index
    %c0_15 = arith.constant 0 : index
    %c0_16 = arith.constant 0 : index
    %15 = vector.load %arg2[%c2_14, %c0_15, %c0_16] : memref<9x8x8xf32, #tpu.memory_space<vmem>>, vector<1x8x8xf32>
    %16 = vector.shape_cast %15 : vector<1x8x8xf32> to vector<8x8xf32>
    %cst_17 = arith.constant dense<0.000000e+00> : vector<8x288xf32>
    %17 = tpu.matmul %16, %14, %cst_17 {dimension_numbers = #tpu.dot_dimension_numbers<[1], [0], [0], [1], [0, 0, 1, 1], [], []>} : vector<8x8xf32>, vector<8x288xf32>, vector<8x288xf32> -> vector<8x288xf32>
    %18 = arith.addf %12, %17 : vector<8x288xf32>
    %c0_18 = arith.constant 0 : index
    %c0_19 = arith.constant 0 : index
    %c18 = arith.constant 18 : index
    %19 = vector.load %arg1[%c0_18, %c0_19, %c18] : memref<1x8x342xf32, #tpu.memory_space<vmem>>, vector<1x8x288xf32>
    %20 = vector.shape_cast %19 : vector<1x8x288xf32> to vector<8x288xf32>
    %c3 = arith.constant 3 : index
    %c0_20 = arith.constant 0 : index
    %c0_21 = arith.constant 0 : index
    %21 = vector.load %arg2[%c3, %c0_20, %c0_21] : memref<9x8x8xf32, #tpu.memory_space<vmem>>, vector<1x8x8xf32>
    %22 = vector.shape_cast %21 : vector<1x8x8xf32> to vector<8x8xf32>
    %cst_22 = arith.constant dense<0.000000e+00> : vector<8x288xf32>
    %23 = tpu.matmul %22, %20, %cst_22 {dimension_numbers = #tpu.dot_dimension_numbers<[1], [0], [0], [1], [0, 0, 1, 1], [], []>} : vector<8x8xf32>, vector<8x288xf32>, vector<8x288xf32> -> vector<8x288xf32>
    %24 = arith.addf %18, %23 : vector<8x288xf32>
    %c0_23 = arith.constant 0 : index
    %c0_24 = arith.constant 0 : index
    %c19 = arith.constant 19 : index
    %25 = vector.load %arg1[%c0_23, %c0_24, %c19] : memref<1x8x342xf32, #tpu.memory_space<vmem>>, vector<1x8x288xf32>
    %26 = vector.shape_cast %25 : vector<1x8x288xf32> to vector<8x288xf32>
    %c4 = arith.constant 4 : index
    %c0_25 = arith.constant 0 : index
    %c0_26 = arith.constant 0 : index
    %27 = vector.load %arg2[%c4, %c0_25, %c0_26] : memref<9x8x8xf32, #tpu.memory_space<vmem>>, vector<1x8x8xf32>
    %28 = vector.shape_cast %27 : vector<1x8x8xf32> to vector<8x8xf32>
    %cst_27 = arith.constant dense<0.000000e+00> : vector<8x288xf32>
    %29 = tpu.matmul %28, %26, %cst_27 {dimension_numbers = #tpu.dot_dimension_numbers<[1], [0], [0], [1], [0, 0, 1, 1], [], []>} : vector<8x8xf32>, vector<8x288xf32>, vector<8x288xf32> -> vector<8x288xf32>
    %30 = arith.addf %24, %29 : vector<8x288xf32>
    %c0_28 = arith.constant 0 : index
    %c0_29 = arith.constant 0 : index
    %c20 = arith.constant 20 : index
    %31 = vector.load %arg1[%c0_28, %c0_29, %c20] : memref<1x8x342xf32, #tpu.memory_space<vmem>>, vector<1x8x288xf32>
    %32 = vector.shape_cast %31 : vector<1x8x288xf32> to vector<8x288xf32>
    %c5 = arith.constant 5 : index
    %c0_30 = arith.constant 0 : index
    %c0_31 = arith.constant 0 : index
    %33 = vector.load %arg2[%c5, %c0_30, %c0_31] : memref<9x8x8xf32, #tpu.memory_space<vmem>>, vector<1x8x8xf32>
    %34 = vector.shape_cast %33 : vector<1x8x8xf32> to vector<8x8xf32>
    %cst_32 = arith.constant dense<0.000000e+00> : vector<8x288xf32>
    %35 = tpu.matmul %34, %32, %cst_32 {dimension_numbers = #tpu.dot_dimension_numbers<[1], [0], [0], [1], [0, 0, 1, 1], [], []>} : vector<8x8xf32>, vector<8x288xf32>, vector<8x288xf32> -> vector<8x288xf32>
    %36 = arith.addf %30, %35 : vector<8x288xf32>
    %c0_33 = arith.constant 0 : index
    %c0_34 = arith.constant 0 : index
    %c36 = arith.constant 36 : index
    %37 = vector.load %arg1[%c0_33, %c0_34, %c36] : memref<1x8x342xf32, #tpu.memory_space<vmem>>, vector<1x8x288xf32>
    %38 = vector.shape_cast %37 : vector<1x8x288xf32> to vector<8x288xf32>
    %c6 = arith.constant 6 : index
    %c0_35 = arith.constant 0 : index
    %c0_36 = arith.constant 0 : index
    %39 = vector.load %arg2[%c6, %c0_35, %c0_36] : memref<9x8x8xf32, #tpu.memory_space<vmem>>, vector<1x8x8xf32>
    %40 = vector.shape_cast %39 : vector<1x8x8xf32> to vector<8x8xf32>
    %cst_37 = arith.constant dense<0.000000e+00> : vector<8x288xf32>
    %41 = tpu.matmul %40, %38, %cst_37 {dimension_numbers = #tpu.dot_dimension_numbers<[1], [0], [0], [1], [0, 0, 1, 1], [], []>} : vector<8x8xf32>, vector<8x288xf32>, vector<8x288xf32> -> vector<8x288xf32>
    %42 = arith.addf %36, %41 : vector<8x288xf32>
    %c0_38 = arith.constant 0 : index
    %c0_39 = arith.constant 0 : index
    %c37 = arith.constant 37 : index
    %43 = vector.load %arg1[%c0_38, %c0_39, %c37] : memref<1x8x342xf32, #tpu.memory_space<vmem>>, vector<1x8x288xf32>
    %44 = vector.shape_cast %43 : vector<1x8x288xf32> to vector<8x288xf32>
    %c7 = arith.constant 7 : index
    %c0_40 = arith.constant 0 : index
    %c0_41 = arith.constant 0 : index
    %45 = vector.load %arg2[%c7, %c0_40, %c0_41] : memref<9x8x8xf32, #tpu.memory_space<vmem>>, vector<1x8x8xf32>
    %46 = vector.shape_cast %45 : vector<1x8x8xf32> to vector<8x8xf32>
    %cst_42 = arith.constant dense<0.000000e+00> : vector<8x288xf32>
    %47 = tpu.matmul %46, %44, %cst_42 {dimension_numbers = #tpu.dot_dimension_numbers<[1], [0], [0], [1], [0, 0, 1, 1], [], []>} : vector<8x8xf32>, vector<8x288xf32>, vector<8x288xf32> -> vector<8x288xf32>
    %48 = arith.addf %42, %47 : vector<8x288xf32>
    %c0_43 = arith.constant 0 : index
    %c0_44 = arith.constant 0 : index
    %c38 = arith.constant 38 : index
    %49 = vector.load %arg1[%c0_43, %c0_44, %c38] : memref<1x8x342xf32, #tpu.memory_space<vmem>>, vector<1x8x288xf32>
    %50 = vector.shape_cast %49 : vector<1x8x288xf32> to vector<8x288xf32>
    %c8 = arith.constant 8 : index
    %c0_45 = arith.constant 0 : index
    %c0_46 = arith.constant 0 : index
    %51 = vector.load %arg2[%c8, %c0_45, %c0_46] : memref<9x8x8xf32, #tpu.memory_space<vmem>>, vector<1x8x8xf32>
    %52 = vector.shape_cast %51 : vector<1x8x8xf32> to vector<8x8xf32>
    %cst_47 = arith.constant dense<0.000000e+00> : vector<8x288xf32>
    %53 = tpu.matmul %52, %50, %cst_47 {dimension_numbers = #tpu.dot_dimension_numbers<[1], [0], [0], [1], [0, 0, 1, 1], [], []>} : vector<8x8xf32>, vector<8x288xf32>, vector<8x288xf32> -> vector<8x288xf32>
    %54 = arith.addf %48, %53 : vector<8x288xf32>
    %c0_48 = arith.constant 0 : index
    %c0_49 = arith.constant 0 : index
    %55 = vector.load %arg3[%c0_48, %c0_49] : memref<8x1xf32, #tpu.memory_space<vmem>>, vector<8x1xf32>
    %56 = vector.broadcast %55 : vector<8x1xf32> to vector<8x288xf32>
    %57 = arith.addf %54, %56 : vector<8x288xf32>
    %cst_50 = arith.constant 0.000000e+00 : f32
    %58 = vector.broadcast %cst_50 : f32 to vector<8x288xf32>
    %59 = arith.maximumf %57, %58 : vector<8x288xf32>
    %c0_51 = arith.constant 0 : index
    %c0_52 = arith.constant 0 : index
    %c0_53 = arith.constant 0 : index
    %60 = vector.load %arg4[%c0_51, %c0_52, %c0_53] : memref<1x8x288xf32, #tpu.memory_space<vmem>>, vector<1x8x288xf32>
    %61 = vector.shape_cast %60 : vector<1x8x288xf32> to vector<8x288xf32>
    %62 = vector.shape_cast %59 : vector<8x288xf32> to vector<1x8x288xf32>
    tpu.vector_store %arg4[%c0_51, %c0_52, %c0_53], %62 {strides = array<i32>} : memref<1x8x288xf32, #tpu.memory_space<vmem>>, vector<1x8x288xf32>,
    return
  }
  func.func @transform_0(%arg0: i32) -> (i32, i32, i32) {
    %c0_i32 = arith.constant 0 : i32
    %c0_i32_0 = arith.constant 0 : i32
    %c0_i32_1 = arith.constant 0 : i32
    return %arg0, %c0_i32, %c0_i32_0 : i32, i32, i32
  }
  func.func @transform_1(%arg0: i32) -> (i32, i32, i32) {
    %c0_i32 = arith.constant 0 : i32
    %c0_i32_0 = arith.constant 0 : i32
    %c0_i32_1 = arith.constant 0 : i32
    %c0_i32_2 = arith.constant 0 : i32
    return %c0_i32, %c0_i32_0, %c0_i32_1 : i32, i32, i32
  }
  func.func @transform_2(%arg0: i32) -> (i32, i32) {
    %c0_i32 = arith.constant 0 : i32
    %c0_i32_0 = arith.constant 0 : i32
    %c0_i32_1 = arith.constant 0 : i32
    return %c0_i32, %c0_i32_0 : i32, i32
  }
  func.func @transform_3(%arg0: i32) -> (i32, i32, i32) {
    %c0_i32 = arith.constant 0 : i32
    %c0_i32_0 = arith.constant 0 : i32
    %c0_i32_1 = arith.constant 0 : i32
    return %arg0, %c0_i32, %c0_i32_0 : i32, i32, i32
  }
}

</mosaic_0001>

<bundles_post_ra>
// kernel: tpu_custom_call.1
= control target key start
LH: loop header
LB: loop body
LE: loop exit
PB: predicated region body
PF: predicated region fallthrough
CT: control target
= control target key end

     0   :  { %8 = vsyncpa [#allocation3], 0  ;;  %s1366_s0 = inlined_call_operand.vmem [shape: f32[2,8,342], index: 0, kind: input, shape index: {}]   ;;  %s1367_s1 = inlined_call_operand.vmem [shape: f32[9,8,8], index: 1, kind: input, shape index: {}]   ;;  %s1368_s2 = inlined_call_operand.vmem [shape: f32[8,1], index: 2, kind: input, shape index: {}]   ;;  %s1369_s3 = inlined_call_operand.hbm [shape: f32[2,8,288], index: 3, kind: output, shape index: {}]  }
   0x1   :  { %10 = vsyncpa [#allocation3 + $0x1], 0  ;;  %s1198_s12 = smov 0   ;;  %s1200_s13 = smov 0  }
   0x2   :  { %s1202_s14 = smov 0   ;;  %s1204_s15 = smov 0  }
   0x3 LB: > { %s1219_s16 = sadd.s32 4294967295, %s1167_s15   ;;  %s969_s17 = sadd.s32 4294967294, %s1167_s15   ;;  %s1167_s15 = sphi %s1204_s15, %s1375_s15   ;;  %s1163_s14 = sphi %s1202_s14, %s1374_s14   ;;  %s1159_s13 = sphi %s1200_s13, %s1373_s13   ;;  %s1155_s12 = sphi %s1198_s12, %s1372_s12  }
   0x4   : > { %s1223_s18 = sadd.s32 1, %s1167_s15   ;;  %s91_s19 = sadd.s32 1, %s1163_s14 }
   0x5   : > { %s88_s20 = ssub.s32 %s1167_s15, %s1223_s18  ;;  %p101_p0 = scmp.ne.s32.totalorder %s1163_s14, %s1159_s13 }
   0x6   : > { %p89_p1 = scmp.eq.s32.totalorder %s88_s20, 0  ;;  %p102_p2 = scmp.eq.s32.totalorder %s1219_s16, 1 }
   0x7   : > { %p107_p3 = scmp.ne.s32.totalorder %s1159_s13, %s1155_s12  ;;  %p108_p4 = scmp.eq.s32.totalorder %s969_s17, 1 }
   0x8   : > { %s1234_s21 = scalar_select %p89_p1, %s1163_s14, %s91_s19  }
   0x9   : > { %p1236_p5 = por %p102_p2, %p101_p0  ;;  %p1240_p6 = por %p108_p4, %p107_p3 }
   0xa   : > { %p972_p7 = scmp.ge.s32.totalorder %s1167_s15, 1  ;;  %p140_p8 = scmp.lt.s32.totalorder %s1167_s15, 3 }
   0xc   : > { %p141_p9 = pnand %p972_p7, %p140_p8 }
   0xd   : > { %p164_p10 = scmp.lt.s32.totalorder (!%p141_p9), %s1219_s16, 1  ;;  %s1169_s29 = smov (!%p141_p9), 126  }
   0xe   : > { %144 = sbr.rel (%p141_p9) target bundleno = 337 (0x151), region = 32  ;;  %s1170_s30 = smov (!%p141_p9), 127  }
   0xf   : > { %s1171_s4 = smov (!%p141_p9), 110   ;;  %s1172_s5 = smov (!%p141_p9), 109  }
  0x10   : > { %s1173_s6 = smov (!%p141_p9), 108   ;;  %s1174_s7 = smov (!%p141_p9), 92  }
  0x11   : > { %s1175_s8 = smov (!%p141_p9), 91   ;;  %s1176_s9 = smov (!%p141_p9), 90  }
  0x12   : > { %s161_s17 = sand.u32 (!%p141_p9), 1, %s1159_s13   ;;  %s1014_s20 = smul.u32 (!%p141_p9), 24, %s1219_s16 }
  0x13   : > { %s165_s24 = scalar_select %p164_p10, %s1219_s16, 1  ;;  %vm190_vm0 = vcmask 64512   ;;  %v172_v6 = vld [vmem:[%s1367_s1] sm:$0xff]  ;;  %vm325_vm1 = vcmask 1031168   ;;  %vm405_vm2 = vcmask 900096   ;;  %v974_v16 = vld [vmem:[%s1367_s1 + $0x8] sm:$0xff] }
  0x14   : > { %vm184_vm3 = vcmask 1039360   ;;  %vm565_vm4 = vcmask 883712   ;;  %v981_v28 = vld [vmem:[%s1367_s1 + $0x10] sm:$0xff]  ;;  %vm485_vm5 = vcmask 891904   ;;  %v985_v35 = vld [vmem:[%s1367_s1 + $0x18] sm:$0xff]  ;;  %vm645_vm6 = vcmask 752640   ;;  %s905_s26 = scalar_lea.hbm %s1369_s3, %s1014_s20 }
  0x15   : > { %s1013_s25 = smul.u32 24, %s165_s24  ;;  %v989_v45 = vld [vmem:[%s1367_s1 + $0x20] sm:$0xff]  ;;  %v993_v47 = vld [vmem:[%s1367_s1 + $0x28] sm:$0xff]  ;;  %v1177_v50 = vmov 0   ;;  %vm725_vm7 = vcmask 744448   ;;  %v997_v56 = vld [vmem:[%s1367_s1 + $0x30] sm:$0xff] }
  0x16   : > { %v877_v48 = vld [vmem:[%s1368_s2] sm:$0xff]  ;;  %1103 = vset.pattern.permute.xlu1 %v1177_v50  ;;  %1104 = vset.pattern.permute.xlu0 %v1177_v50  ;;  %vm805_vm8 = vcmask 736256   ;;  %v1001_v63 = vld [vmem:[%s1367_s1 + $0x38] sm:$0xff]  ;;  %s1012_s19 = smul.u32 24, %s161_s17  ;;  %vm891_vm9 = vcmask 261120  }
  0x17   : > { %s168_s28 = scalar_lea.vmem %s1366_s0, %s1013_s25 }
  0x18   : > { %v169_v0 = vld [vmem:[%s168_s28] sm:$0xff]  ;;  %v1251_v1 = vld [vmem:[%s168_s28 + $0x8] sm:$0xff]  ;;  %v1253_v2 = vld [vmem:[%s168_s28 + $0x10] sm:$0xff]  ;;  %s163_s16 = scalar_lea.vmem [#allocation2], %s1012_s19  ;;  %s909_s28 = sshll.u32 %s905_s26, 4  ;;  %s910_s28 = int_to_ptr.hbm [resolvable:$true] %s909_s28 }
  0x19   : > { %v1068_v3 = vpack.i.bf16 %v1251_v1, %v169_v0  ;;  %v1063_v4 = vpack.i.bf16 %v169_v0, %v1253_v2  ;;  %v1073_v5 = vpack.i.bf16 %v1253_v2, %v1251_v1  ;;  %272 = vmatpush.msra.mxu3 %v169_v0  ;;  %s907_s27 = sshll.u32 %s163_s16, 4  ;;  %s908_s27 = int_to_ptr.vmem [resolvable:$true] %s907_s27 }
  0x1a   : > { %978 = vmatmul.msk.f32.vlgmr.msra.gmra.mxu3 %vm190_vm0, %v172_v6 }
  0x1b   : > { %1069 = vrot.lane.b32.xlu1 %v1068_v3, %s1169_s29  ;;  %1064 = vrot.lane.b32.xlu0 %v1063_v4, %s1170_s30 }
  0x1c   : > { %1074 = vrot.lane.b32.xlu2 %v1073_v5, %s1171_s4 }
  0x23   : > { %323 = vrot.lane.b32.xlu1 %v1253_v2, %s1169_s29  ;;  %180 = vrot.lane.b32.xlu0 %v1251_v1, %s1170_s30  ;;  %s894_s29 = scalar_lea.sflag [#allocation3], %s161_s17  ;;  %s1119_s30 = sshra.s32 %s910_s28, 4  ;;  %s1120_s30 = int_to_ptr.hbm [resolvable:$true] %s1119_s30 }
  0x24   : > { %399 = vrot.lane.b32.xlu2 %v169_v0, %s1171_s4  ;;  %s1121_s4 = scalar_lea.hbm %s1120_s30, 24  ;;  %p1126_p0 = scmp.lt.s32.totalorder %s1120_s30, %s1369_s3 }
  0x25   : > { %p1122_p11 = scmp.ne.s32.totalorder %s1120_s30, %s1121_s4 }
  0x27   : > { %p1123_p12 = pnand %p1122_p11, %p1236_p5 }
  0x29   : > { %p1124_p13 = pneg %p1123_p12 }
  0x2b   : > { %481 = vrot.lane.b32.xlu1 %v1251_v1, %s1172_s5  ;;  %1079 = vrot.lane.b32.xlu0 %v1063_v4, %s1172_s5 }
  0x2c   : > { %1084 = vrot.lane.b32.xlu2 %v1068_v3, %s1173_s6 }
  0x33   : > { %563 = vrot.lane.b32.xlu1 %v1253_v2, %s1173_s6  ;;  %1089 = vrot.lane.b32.xlu0 %v1068_v3, %s1174_s7 }
  0x34   : > { %643 = vrot.lane.b32.xlu2 %v1253_v2, %s1174_s7  ;;  %s1125_s7 = scalar_lea.hbm %s1369_s3, 48 }
  0x35   : > { %p1127_p1 = scmp.lt.s32.totalorder %s1125_s7, %s1121_s4 }
  0x37   : > { %p1128_p2 = por %p1127_p1, %p1126_p0 }
  0x39   : > { %p1129_p3 = pnand %p1128_p2, %p1124_p13 }
  0x3b   : > { %1094 = vrot.lane.b32.xlu0 %v1073_v5, %s1175_s8  ;;  %719 = vrot.lane.b32.xlu1 %v169_v0, %s1175_s8  ;;  %v1005_v0 = vld [vmem:[%s1367_s1 + $0x40] sm:$0xff] }
  0x3c   : > { %1099 = vrot.lane.b32.xlu2 %v1063_v4, %s1176_s9 }
  0x43   : > { %801 = vrot.lane.b32.xlu0 %v1251_v1, %s1176_s9  ;;  %880 = vperm.xlu1 %1103, %v877_v48  }
  0x76   : > { %v1075_v7 = vpop.permute.xlu2 %1074 }
  0x77   : > { %v1077_v9 = vunpack.i.h.bf16 %v1075_v7  ;;  %v1076_v10 = vunpack.i.l.bf16 %v1075_v7 }
  0x79   : > { %v407_v18 = vsel %vm405_vm2, %v1076_v10, %v1077_v9 }
  0x7e   : > { %v400_v8 = vpop.permute.xlu2 %399 }
  0x7f   : > { %v406_v29 = vsel %vm405_vm2, %v400_v8, %v1076_v10 }
  0x86   : > { %v1085_v19 = vpop.permute.xlu2 %1084 }
  0x87   : > { %v1087_v23 = vunpack.i.h.bf16 %v1085_v19  ;;  %v1086_v27 = vunpack.i.l.bf16 %v1085_v19 }
  0x89   : > { %v566_v30 = vsel %vm565_vm4, %v1086_v27, %v1087_v23 }
  0x8d   : > { %v1070_v11 = vpop.permute.xlu1 %1069  ;;  %v1065_v12 = vpop.permute.xlu0 %1064 }
  0x8e   : > { %v1072_v13 = vunpack.i.h.bf16 %v1070_v11  ;;  %v1071_v14 = vunpack.i.l.bf16 %v1070_v11  ;;  %v1066_v15 = vunpack.i.l.bf16 %v1065_v12  ;;  %v1067_v20 = vunpack.i.h.bf16 %v1065_v12  ;;  %v644_v38 = vpop.permute.xlu2 %643 }
  0x90   : > { %249 = vmatpush.msra.mxu2 %v1066_v15  ;;  %v326_v17 = vsel %vm325_vm1, %v1071_v14, %v1072_v13 }
  0x91   : > { %977 = vmatmul.msk.f32.vlgmr.msra.gmra.mxu2 %vm190_vm0, %v974_v16 }
  0x92   : > { %349 = vmatpush.msrb.mxu2 %v326_v17 }
  0x94   : > { %449 = vmatpush.msra.mxu2 %v407_v18 }
  0x95   : > { %v324_v21 = vpop.permute.xlu1 %323  ;;  %v181_v22 = vpop.permute.xlu0 %180 }
  0x96   : > { %v185_v24 = vsel %vm184_vm3, %v1067_v20, %v181_v22  ;;  %v186_v25 = vsel %vm184_vm3, %v181_v22, %v1066_v15  ;;  %v327_v26 = vsel %vm325_vm1, %v1072_v13, %v324_v21  ;;  %v1100_v49 = vpop.permute.xlu2 %1099 }
  0x97   : > { %209 = vmatpush.msra.mxu0 %v185_v24  ;;  %229 = vmatpush.msra.mxu1 %v186_v25  ;;  %v1101_v58 = vunpack.i.l.bf16 %v1100_v49  ;;  %v1102_v59 = vunpack.i.h.bf16 %v1100_v49 }
  0x98   : > { %369 = vmatpush.msrb.mxu3 %v327_v26  ;;  %975 = vmatmul.msk.f32.vlgmr.msra.gmra.mxu0 %vm190_vm0, %v974_v16 }
  0x99   : > { %976 = vmatmul.msk.f32.vlgmr.msra.gmra.mxu1 %vm190_vm0, %v974_v16  ;;  %292 = vmatpush.msrb.mxu0 %v1251_v1 }
  0x9a   : > { %312 = vmatpush.msrb.mxu1 %v1253_v2  ;;  %469 = vmatpush.msra.mxu3 %v1077_v9 }
  0x9b   : > { %982 = vmatmul.msk.f32.vlgmr.msrb.gmra.mxu2 %vm190_vm0, %v981_v28  ;;  %389 = vmatpush.msra.mxu0 %v324_v21 }
  0x9c   : > { %429 = vmatpush.msra.mxu1 %v406_v29  ;;  %983 = vmatmul.msk.f32.vlgmr.msrb.gmra.mxu3 %vm190_vm0, %v981_v28 }
  0x9d   : > { %v482_v31 = vpop.permute.xlu1 %481  ;;  %v1080_v32 = vpop.permute.xlu0 %1079  ;;  %589 = vmatpush.msrb.mxu3 %v566_v30 }
  0x9e   : > { %v1082_v33 = vunpack.i.h.bf16 %v1080_v32  ;;  %v1081_v34 = vunpack.i.l.bf16 %v1080_v32  ;;  %v274_v4 = vpop.f32.mrf.mxu3 }
  0xa0   : > { %979 = vmatmul.msk.f32.vlgmr.msrb.gmra.mxu0 %vm190_vm0, %v172_v6  ;;  %549 = vmatpush.msrb.mxu2 %v1081_v34  ;;  %v486_v36 = vsel %vm485_vm5, %v1082_v33, %v482_v31  ;;  %v487_v37 = vsel %vm485_vm5, %v482_v31, %v1081_v34 }
  0xa1   : > { %980 = vmatmul.msk.f32.vlgmr.msrb.gmra.mxu1 %vm190_vm0, %v172_v6  ;;  %509 = vmatpush.msrb.mxu0 %v486_v36 }
  0xa2   : > { %529 = vmatpush.msrb.mxu1 %v487_v37 }
  0xa3   : > { %987 = vmatmul.msk.f32.vlgmr.msra.gmra.mxu2 %vm190_vm0, %v985_v35 }
  0xa4   : > { %988 = vmatmul.msk.f32.vlgmr.msra.gmra.mxu3 %vm190_vm0, %v985_v35 }
  0xa5   : > { %v564_v39 = vpop.permute.xlu1 %563  ;;  %v1090_v40 = vpop.permute.xlu0 %1089 }
  0xa6   : > { %v567_v41 = vsel %vm565_vm4, %v1087_v23, %v564_v39  ;;  %v1092_v42 = vunpack.i.h.bf16 %v1090_v40  ;;  %v1091_v43 = vunpack.i.l.bf16 %v1090_v40 }
  0xa8   : > { %v647_v44 = vsel %vm645_vm6, %v1092_v42, %v644_v38  ;;  %984 = vmatmul.msk.f32.vlgmr.msra.gmra.mxu0 %vm190_vm0, %v981_v28  ;;  %v646_v46 = vsel %vm645_vm6, %v1091_v43, %v1092_v42 }
  0xa9   : > { %986 = vmatmul.msk.f32.vlgmr.msra.gmra.mxu1 %vm190_vm0, %v985_v35  ;;  %609 = vmatpush.msra.mxu0 %v567_v41 }
  0xaa   : > { %669 = vmatpush.msra.mxu2 %v646_v46  ;;  %689 = vmatpush.msra.mxu3 %v647_v44 }
  0xab   : > { %992 = vmatmul.msk.f32.vlgmr.msrb.gmra.mxu2 %vm190_vm0, %v989_v45  ;;  %629 = vmatpush.msra.mxu1 %v564_v39 }
  0xac   : > { %994 = vmatmul.msk.f32.vlgmr.msrb.gmra.mxu3 %vm190_vm0, %v993_v47 }
  0xad   : > { %v1095_v51 = vpop.permute.xlu0 %1094  ;;  %v720_v52 = vpop.permute.xlu1 %719 }
  0xae   : > { %v1097_v53 = vunpack.i.h.bf16 %v1095_v51  ;;  %v1096_v54 = vunpack.i.l.bf16 %v1095_v51 }
  0xb0   : > { %v726_v55 = vsel %vm725_vm7, %v720_v52, %v1096_v54  ;;  %990 = vmatmul.msk.f32.vlgmr.msrb.gmra.mxu0 %vm190_vm0, %v989_v45  ;;  %789 = vmatpush.msrb.mxu3 %v1097_v53  ;;  %v727_v57 = vsel %vm725_vm7, %v1096_v54, %v1097_v53 }
  0xb1   : > { %991 = vmatmul.msk.f32.vlgmr.msrb.gmra.mxu1 %vm190_vm0, %v989_v45  ;;  %709 = vmatpush.msrb.mxu0 %v644_v38 }
  0xb2   : > { %749 = vmatpush.msrb.mxu1 %v726_v55  ;;  %769 = vmatpush.msrb.mxu2 %v727_v57 }
  0xb3   : > { %998 = vmatmul.msk.f32.vlgmr.msra.gmra.mxu2 %vm190_vm0, %v997_v56 }
  0xb4   : > { %999 = vmatmul.msk.f32.vlgmr.msra.gmra.mxu3 %vm190_vm0, %v997_v56  ;;  %869 = vmatpush.msra.mxu2 %v1101_v58 }
  0xb5   : > { %v802_v60 = vpop.permute.xlu0 %801 }
  0xb6   : > { %v806_v61 = vsel %vm805_vm8, %v1102_v59, %v802_v60  ;;  %v807_v62 = vsel %vm805_vm8, %v802_v60, %v1101_v58 }
  0xb8   : > { %995 = vmatmul.msk.f32.vlgmr.msra.gmra.mxu0 %vm190_vm0, %v993_v47 }
  0xb9   : > { %996 = vmatmul.msk.f32.vlgmr.msra.gmra.mxu1 %vm190_vm0, %v993_v47  ;;  %829 = vmatpush.msra.mxu0 %v806_v61  ;;  %v881_v47 = vpop.permute.xlu1 %880 }
  0xba   : > { %849 = vmatpush.msra.mxu1 %v807_v62 }
  0xbb   : > { %1003 = vmatmul.msk.f32.vlgmr.msrb.gmra.mxu2 %vm190_vm0, %v1001_v63 }
  0xbc   : > { %1004 = vmatmul.msk.f32.vlgmr.msrb.gmra.mxu3 %vm190_vm0, %v1001_v63 }
  0xc0   : > { %1000 = vmatmul.msk.f32.vlgmr.msrb.gmra.mxu0 %vm190_vm0, %v997_v56 }
  0xc1   : > { %1002 = vmatmul.msk.f32.vlgmr.msrb.gmra.mxu1 %vm190_vm0, %v1001_v63 }
  0xc3   : > { %1008 = vmatmul.msk.f32.vlgmr.msra.gmra.mxu2 %vm190_vm0, %v1005_v0 }
  0xc8   : > { %1006 = vmatmul.msk.f32.vlgmr.msra.gmra.mxu0 %vm190_vm0, %v1005_v0 }
  0xc9   : > { %1007 = vmatmul.msk.f32.vlgmr.msra.gmra.mxu1 %vm190_vm0, %v1005_v0 }
 0x114   : > { %v251_v1 = vpop.f32.mrf.mxu2 }
 0x115   : > { %v211_v2 = vpop.f32.mrf.mxu0 }
 0x116   : > { %v231_v3 = vpop.f32.mrf.mxu1  ;;  %v275_v20 = vadd.f32 %v274_v4, %v211_v2 }
 0x11d   : > { %v294_v5 = vpop.f32.mrf.mxu0 }
 0x11e   : > { %v351_v6 = vpop.f32.mrf.mxu2  ;;  %v314_v7 = vpop.f32.mrf.mxu1  ;;  %v295_v17 = vadd.f32 %v294_v5, %v231_v3 }
 0x11f   : > { %v371_v8 = vpop.f32.mrf.mxu3  ;;  %v315_v18 = vadd.f32 %v314_v7, %v251_v1  ;;  %v394_v24 = vadd.f32 %v351_v6, %v275_v20 }
 0x120   : > { %v395_v26 = vadd.f32 %v371_v8, %v295_v17 }
 0x125   : > { %v391_v9 = vpop.f32.mrf.mxu0 }
 0x126   : > { %v451_v10 = vpop.f32.mrf.mxu2  ;;  %v431_v11 = vpop.f32.mrf.mxu1  ;;  %v396_v23 = vadd.f32 %v391_v9, %v315_v18 }
 0x127   : > { %v471_v12 = vpop.f32.mrf.mxu3  ;;  %v474_v27 = vadd.f32 %v431_v11, %v394_v24  ;;  %v475_v28 = vadd.f32 %v451_v10, %v395_v26 }
 0x128   : > { %v476_v29 = vadd.f32 %v471_v12, %v396_v23 }
 0x12d   : > { %v511_v13 = vpop.f32.mrf.mxu0 }
 0x12e   : > { %v551_v14 = vpop.f32.mrf.mxu2  ;;  %v531_v15 = vpop.f32.mrf.mxu1  ;;  %v554_v30 = vadd.f32 %v511_v13, %v474_v27 }
 0x12f   : > { %v591_v16 = vpop.f32.mrf.mxu3  ;;  %v556_v31 = vadd.f32 %v551_v14, %v476_v29  ;;  %v555_v32 = vadd.f32 %v531_v15, %v475_v28 }
 0x130   : > { %v634_v38 = vadd.f32 %v591_v16, %v554_v30 }
 0x135   : > { %v611_v19 = vpop.f32.mrf.mxu0 }
 0x136   : > { %v671_v21 = vpop.f32.mrf.mxu2  ;;  %v631_v22 = vpop.f32.mrf.mxu1  ;;  %v635_v36 = vadd.f32 %v611_v19, %v555_v32 }
 0x137   : > { %v691_v25 = vpop.f32.mrf.mxu3  ;;  %v636_v37 = vadd.f32 %v631_v22, %v556_v31  ;;  %v714_v40 = vadd.f32 %v671_v21, %v634_v38 }
 0x138   : > { %v715_v42 = vadd.f32 %v691_v25, %v635_v36 }
 0x13d   : > { %v711_v33 = vpop.f32.mrf.mxu0 }
 0x13e   : > { %v771_v34 = vpop.f32.mrf.mxu2  ;;  %v751_v35 = vpop.f32.mrf.mxu1  ;;  %v716_v39 = vadd.f32 %v711_v33, %v636_v37 }
 0x13f   : > { %v791_v41 = vpop.f32.mrf.mxu3  ;;  %v794_v43 = vadd.f32 %v751_v35, %v714_v40  ;;  %v795_v44 = vadd.f32 %v771_v34, %v715_v42 }
 0x140   : > { %v796_v45 = vadd.f32 %v791_v41, %v716_v39 }
 0x145   : > { %v831_v46 = vpop.f32.mrf.mxu0 }
 0x146   : > { %v871_v48 = vpop.f32.mrf.mxu2  ;;  %v874_v49 = vadd.f32 %v831_v46, %v794_v43  ;;  %v851_v50 = vpop.f32.mrf.mxu1 }
 0x147   : > { %v876_v51 = vadd.f32 %v871_v48, %v796_v45  ;;  %v875_v52 = vadd.f32 %v851_v50, %v795_v44 }
 0x148   : > { %v883_v53 = vadd.f32 %v881_v47, %v874_v49 }
 0x149   : > { %v884_v54 = vadd.f32 %v881_v47, %v875_v52  ;;  %v885_v55 = vadd.f32 %v881_v47, %v876_v51 }
 0x14a   : > { %v886_v56 = vmax.f32 %v883_v53, 0.0 }
 0x14b   : > { %v887_v57 = vmax.f32 %v884_v54, 0.0  ;;  %v888_v58 = vmax.f32 %v885_v55, 0.0 }
 0x14c   : > { %889 = vst [vmem:[%s163_s16] sm:$0xff] %v886_v56 }
 0x14d   : > { %890 = vst [vmem:[%s163_s16 + $0x8] sm:$0xff] %v887_v57 }
 0x14e   : > { %892 = vst.msk [vmem:[%s163_s16 + $0x10] sm:$0xff] %vm891_vm9, %v888_v58 }
 0x14f   : > { %1132 = shalt.err (!%p1129_p3)
}
 0x150   : > { %1015 = dma.vmem_to_hbm [thread:$0]  (%p1236_p5), %s908_s27, 384, %s910_s28, %s894_s29  }
 0x151 PF: > { %p1021_p4 = scmp.ge.s32.totalorder %s1167_s15, 2  ;;  %s921_s10 = sand.u32 1, %s1155_s12  }
 0x152   : > { %s922_s11 = scalar_lea.sflag [#allocation3], %s921_s10 }
 0x153   : > { %p1018_p7 = pnand %p1021_p4, %p1240_p6 }
 0x155   : > { %p1019_p8 = pneg %p1018_p7 }
 0x157   : > { %1150 = dma.done.wait (%p1019_p8), %s922_s11, 384  }
 0x158   : > { %1152 = vsyncadd (%p1019_p8), %s922_s11, 4294966912  ;;  %p13_p9 = scmp.ge.s32.totalorder %s1223_s18, 4   ;;  %s1372_s12 = smov %s1159_s13 }
 0x159   : > { %s1373_s13 = smov %s1163_s14  ;;  %s1374_s14 = smov %s1234_s21 }
 0x15a   : > { %s1375_s15 = smov %s1223_s18  ;;  %15 = sbr.rel (!%p13_p9) target bundleno = 3 (0x3), region = 75 }
 0x15f   :  { %928 = vsyncpa [#allocation3], 1 }
 0x160   :  { %930 = vsyncpa [#allocation3 + $0x1], 1 }

</bundles_post_ra>
